<compile_context>
chip_gen: v6e
topology: v6e:2x2x1
jax: 0.10.0
libtpu: 0.0.40
codegen_flags: <defaults>
</compile_context>

<pallas_src>
import jax
import jax.numpy as jnp
from jax.experimental import pallas as pl
from jax.experimental.pallas import tpu as pltpu

EPS = 1e-5


def residual_kernel(x_ref, w_ref, gb_ref, y_ref):
    # x_ref:  (B, I)    full batch, resident across the O-grid
    # w_ref:  (I, tn)   column slab of the (pre-transposed) Linear weight
    # gb_ref: (2, tn)   row 0 = gamma, row 1 = beta
    # y_ref:  (B, tn)   relu(batchnorm(x @ w)) slab
    x = x_ref[...]
    w = w_ref[...]

    # Linear (bias omitted: it cancels in the BatchNorm centering below).
    h = jnp.dot(x, w, preferred_element_type=jnp.float32)

    # Single-pass biased batch statistics over the batch dim.
    inv_b = 1.0 / h.shape[0]
    s1 = jnp.sum(h, axis=0, keepdims=True)
    s2 = jnp.sum(h * h, axis=0, keepdims=True)
    mean = s1 * inv_b
    var = jnp.maximum(s2 * inv_b - mean * mean, 0.0)

    # Fused BN affine: hn = h * scale + shift.
    gamma = gb_ref[0:1, :]
    beta = gb_ref[1:2, :]
    scale = gamma * jax.lax.rsqrt(var + EPS)
    shift = beta - mean * scale

    y = jnp.maximum(h * scale + shift, 0.0)
    y_ref[...] = y.astype(y_ref.dtype)


def _pick_tile_n(o):
    # Prefer 256-wide column slabs (matches v6e/v7x 2x256^2 MXU), else 128,
    # else fall back to the full (possibly unaligned) feature dim.
    if o % 256 == 0:
        return 256
    if o % 128 == 0:
        return 128
    return o


def residual_forward(x, w_t, b, gamma, beta, *, tn=None):
    """x: (B, I) f32, w_t: (I, O) pre-transposed Linear weight,
    b/gamma/beta: (O,). Returns concat([relu(bn(x @ w_t + b)), x], axis=1).

    `b` is accepted for interface parity with nn.Linear but not sent to the
    kernel: training-mode BatchNorm cancels a per-feature bias exactly."""
    del b
    B, I = x.shape
    O = w_t.shape[1]
    if tn is None:
        tn = _pick_tile_n(O)
    assert O % tn == 0

    gb = jnp.stack([gamma, beta], axis=0)  # (2, O) packed BN params

    y = pl.pallas_call(
        residual_kernel,
        out_shape=jax.ShapeDtypeStruct((B, O), x.dtype),
        grid_spec=pltpu.PrefetchScalarGridSpec(
            num_scalar_prefetch=0,
            grid=(O // tn,),
            in_specs=[
                pl.BlockSpec((B, I), lambda j: (0, 0)),   # x resident (not re-DMA'd)
                pl.BlockSpec((I, tn), lambda j: (0, j)),  # weight column slab
                pl.BlockSpec((2, tn), lambda j: (0, j)),  # packed gamma/beta
            ],
            out_specs=pl.BlockSpec((B, tn), lambda j: (0, j)),
        ),
        compiler_params=pltpu.CompilerParams(
            # Feature tiles are independent -> shard across TCs (v7x megacore).
            dimension_semantics=("parallel",),
        ),
    )(x, w_t, gb)

    # Residual concat is pure data movement; let XLA handle it outside the
    # kernel instead of streaming x through vregs and back to HBM.
    return jnp.concatenate([y, x], axis=1)


def residual_reference(x, w_t, b, gamma, beta):
    """Pure-JAX reference matching PyTorch Residual.forward (training-mode BN,
    including the Linear bias)."""
    h = x @ w_t + b
    mean = jnp.mean(h, axis=0, keepdims=True)
    var = jnp.mean((h - mean) ** 2, axis=0, keepdims=True)  # biased
    hn = (h - mean) / jnp.sqrt(var + EPS) * gamma + beta
    y = jnp.maximum(hn, 0.0)
    return jnp.concatenate([y, x], axis=1)


if __name__ == "__main__":
    # CTGAN-ish but small: batch / feature dims stay (8,128)-aligned so every
    # store is lane-dense; O = 512 with tn = 256 exercises the O-tiled grid.
    B, I, O = 128, 128, 512

    key = jax.random.PRNGKey(0)
    kx, kw, kb, kg, kbe = jax.random.split(key, 5)

    x = jax.random.normal(kx, (B, I), dtype=jnp.float32)
    # Linear(i, o): weight (O, I), bias (O,). Store the weight transposed as
    # (I, O) so the MXU matmul is a plain x @ W.
    w = jax.random.normal(kw, (O, I), dtype=jnp.float32) * (1.0 / jnp.sqrt(I))
    w_t = w.T
    b = jax.random.normal(kb, (O,), dtype=jnp.float32) * 0.1
    # BatchNorm1d affine params (perturbed from the default gamma=1, beta=0 so
    # the affine path is actually exercised).
    gamma = 1.0 + 0.1 * jax.random.normal(kg, (O,), dtype=jnp.float32)
    beta = 0.1 * jax.random.normal(kbe, (O,), dtype=jnp.float32)

    out = residual_forward(x, w_t, b, gamma, beta)
    out = jax.block_until_ready(out)

    ref = residual_reference(x, w_t, b, gamma, beta)
    assert out.shape == (B, O + I), out.shape
    max_err = float(jnp.max(jnp.abs(out - ref)))
    assert jnp.allclose(out, ref, atol=1e-4, rtol=1e-4), max_err

    print("KERNEL_OK")
</pallas_src>

<mosaic_0001>
module attributes {stable_mosaic.version = 11 : i64} {
  func.func @residual_kernel(%arg0: i32, %arg1: memref<128x128xf32, #tpu.memory_space<vmem>>, %arg2: memref<128x256xf32, #tpu.memory_space<vmem>>, %arg3: memref<2x256xf32, #tpu.memory_space<vmem>>, %arg4: memref<128x256xf32, #tpu.memory_space<vmem>>) attributes {dimension_semantics = [#tpu.dimension_semantics<parallel>], iteration_bounds = array<i64: 2>, scalar_prefetch = 0 : i64, scratch_operands = 0 : i64, tpu.core_type = #tpu.core_type<tc>, window_params = [{pipeline_mode = #tpu.pipeline_mode<synchronous>, transform_indices = @transform_0, window_bounds = array<i64: 128, 128>}, {transform_indices = @transform_1, window_bounds = array<i64: 128, 256>}, {transform_indices = @transform_2, window_bounds = array<i64: 2, 256>}, {transform_indices = @transform_3, window_bounds = array<i64: 128, 256>}]} {
    %c0 = arith.constant 0 : index
    %c0_0 = arith.constant 0 : index
    %0 = vector.load %arg1[%c0, %c0_0] : memref<128x128xf32, #tpu.memory_space<vmem>>, vector<128x128xf32>
    %c0_1 = arith.constant 0 : index
    %c0_2 = arith.constant 0 : index
    %1 = vector.load %arg2[%c0_1, %c0_2] : memref<128x256xf32, #tpu.memory_space<vmem>>, vector<128x256xf32>
    %cst = arith.constant dense<0.000000e+00> : vector<128x256xf32>
    %2 = tpu.matmul %0, %1, %cst {dimension_numbers = #tpu.dot_dimension_numbers<[1], [0], [0], [1], [0, 0, 1, 1], [], []>} : vector<128x128xf32>, vector<128x256xf32>, vector<128x256xf32> -> vector<128x256xf32>
    %cst_3 = arith.constant dense<0.000000e+00> : vector<256xf32>
    %3 = vector.multi_reduction <add>, %2, %cst_3 [0] : vector<128x256xf32> to vector<256xf32>
    %4 = vector.shape_cast %3 : vector<256xf32> to vector<1x256xf32>
    %5 = arith.mulf %2, %2 : vector<128x256xf32>
    %cst_4 = arith.constant dense<0.000000e+00> : vector<256xf32>
    %6 = vector.multi_reduction <add>, %5, %cst_4 [0] : vector<128x256xf32> to vector<256xf32>
    %7 = vector.shape_cast %6 : vector<256xf32> to vector<1x256xf32>
    %cst_5 = arith.constant 7.812500e-03 : f32
    %8 = vector.broadcast %cst_5 : f32 to vector<1x256xf32>
    %9 = arith.mulf %4, %8 : vector<1x256xf32>
    %cst_6 = arith.constant 7.812500e-03 : f32
    %10 = vector.broadcast %cst_6 : f32 to vector<1x256xf32>
    %11 = arith.mulf %7, %10 : vector<1x256xf32>
    %12 = arith.mulf %9, %9 : vector<1x256xf32>
    %13 = arith.subf %11, %12 : vector<1x256xf32>
    %cst_7 = arith.constant 0.000000e+00 : f32
    %14 = vector.broadcast %cst_7 : f32 to vector<1x256xf32>
    %15 = arith.maximumf %13, %14 : vector<1x256xf32>
    %c0_8 = arith.constant 0 : index
    %c0_9 = arith.constant 0 : index
    %16 = vector.load %arg3[%c0_8, %c0_9] : memref<2x256xf32, #tpu.memory_space<vmem>>, vector<1x256xf32>
    %c1 = arith.constant 1 : index
    %c0_10 = arith.constant 0 : index
    %17 = vector.load %arg3[%c1, %c0_10] : memref<2x256xf32, #tpu.memory_space<vmem>>, vector<1x256xf32>
    %cst_11 = arith.constant 9.99999974E-6 : f32
    %18 = vector.broadcast %cst_11 : f32 to vector<1x256xf32>
    %19 = arith.addf %15, %18 : vector<1x256xf32>
    %20 = math.rsqrt %19 : vector<1x256xf32>
    %21 = arith.mulf %16, %20 : vector<1x256xf32>
    %22 = arith.mulf %9, %21 : vector<1x256xf32>
    %23 = arith.subf %17, %22 : vector<1x256xf32>
    %24 = vector.broadcast %21 : vector<1x256xf32> to vector<128x256xf32>
    %25 = arith.mulf %2, %24 : vector<128x256xf32>
    %26 = vector.broadcast %23 : vector<1x256xf32> to vector<128x256xf32>
    %27 = arith.addf %25, %26 : vector<128x256xf32>
    %cst_12 = arith.constant 0.000000e+00 : f32
    %28 = vector.broadcast %cst_12 : f32 to vector<128x256xf32>
    %29 = arith.maximumf %27, %28 : vector<128x256xf32>
    %c0_13 = arith.constant 0 : index
    %c0_14 = arith.constant 0 : index
    %30 = vector.load %arg4[%c0_13, %c0_14] : memref<128x256xf32, #tpu.memory_space<vmem>>, vector<128x256xf32>
    tpu.vector_store %arg4[%c0_13, %c0_14], %29 {strides = array<i32>} : memref<128x256xf32, #tpu.memory_space<vmem>>, vector<128x256xf32>,
    return
  }
  func.func @transform_0(%arg0: i32) -> (i32, i32) {
    %c0_i32 = arith.constant 0 : i32
    %c0_i32_0 = arith.constant 0 : i32
    %c0_i32_1 = arith.constant 0 : i32
    return %c0_i32, %c0_i32_0 : i32, i32
  }
  func.func @transform_1(%arg0: i32) -> (i32, i32) {
    %c0_i32 = arith.constant 0 : i32
    %c0_i32_0 = arith.constant 0 : i32
    return %c0_i32, %arg0 : i32, i32
  }
  func.func @transform_2(%arg0: i32) -> (i32, i32) {
    %c0_i32 = arith.constant 0 : i32
    %c0_i32_0 = arith.constant 0 : i32
    return %c0_i32, %arg0 : i32, i32
  }
  func.func @transform_3(%arg0: i32) -> (i32, i32) {
    %c0_i32 = arith.constant 0 : i32
    %c0_i32_0 = arith.constant 0 : i32
    return %c0_i32, %arg0 : i32, i32
  }
}

</mosaic_0001>

<bundles_post_ra>
// kernel: tpu_custom_call.1
= control target key start
LH: loop header
LB: loop body
LE: loop exit
PB: predicated region body
PF: predicated region fallthrough
CT: control target
= control target key end

     0   :  { %8 = vsyncpa [#allocation3], 0  ;;  %s1764_s0 = inlined_call_operand.hbm [shape: f32[128,128], index: 0, kind: input, shape index: {}]   ;;  %s1765_s1 = inlined_call_operand.hbm [shape: f32[128,512], index: 1, kind: input, shape index: {}]   ;;  %s1766_s2 = inlined_call_operand.hbm [shape: f32[2,512], index: 2, kind: input, shape index: {}]   ;;  %s1767_s3 = inlined_call_operand.hbm [shape: f32[128,512], index: 3, kind: output, shape index: {}]  }
   0x1   :  { %9 = vsyncpa [#allocation6], 0 }
   0x2   :  { %11 = vsyncpa [#allocation6 + $0x1], 0 }
   0x3   :  { %12 = vsyncpa [#allocation4], 0 }
   0x4   :  { %14 = vsyncpa [#allocation4 + $0x1], 0  ;;  %s1211_s12 = smov 0   ;;  %s1213_s13 = smov 0  }
   0x5   :  { %s1215_s14 = smov 0   ;;  %s1217_s15 = smov 0  }
   0x6 LB: > { %s1232_s16 = sadd.s32 1, %s1175_s15   ;;  %s48_s17 = sadd.s32 1, %s1171_s14  ;;  %s1175_s15 = sphi %s1217_s15, %s1789_s15   ;;  %s1171_s14 = sphi %s1215_s14, %s1788_s14   ;;  %s1167_s13 = sphi %s1213_s13, %s1787_s13   ;;  %s1163_s12 = sphi %s1211_s12, %s1786_s12  }
   0x7   : > { %s45_s18 = ssub.s32 %s1175_s15, %s1232_s16  ;;  %p55_p0 = scmp.ne.s32.totalorder %s1171_s14, %s1167_s13 }
   0x8   : > { %p46_p1 = scmp.eq.s32.totalorder %s45_s18, 0  ;;  %p56_p2 = scmp.eq.s32.totalorder %s1175_s15, 0 }
   0x9   : > { %p975_p4 = scmp.lt.s32.totalorder %s1175_s15, 2  ;;  %s150_s20 = sand.u32 1, %s1175_s15  }
   0xa   : > { %s1243_s19 = scalar_select %p46_p1, %s1171_s14, %s48_s17  }
   0xb   : > { %p57_p5 = por %p56_p2, %p55_p0  ;;  %s152_s21 = sand.u32 1, %s1171_s14  }
   0xc   : > { %s897_s22 = sshll.u32 %s152_s21, 8  ;;  %s914_s23 = sshll.u32 %s1175_s15, 8 }
   0xd   : > { %s1256_s26 = scalar_lea.hbm %s1765_s1, %s914_s23  ;;  %s154_s27 = scalar_lea.vmem [#allocation5], %s897_s22 }
   0xe   : > { %s161_s28 = sshll.u32 %s154_s27, 4  ;;  %p1258_p6 = pnand %p975_p4, %p57_p5  ;;  %s1262_s28 = int_to_ptr.vmem [resolvable:$true] %s161_s28 }
   0xf   : > { %s1264_s30 = scalar_lea.sflag [#allocation6], %s150_s20  ;;  %s1025_s4 = scalar_lea.hbm %s1256_s26, 4096 }
  0x10   : > { %p1026_p7 = scmp.ne.s32.totalorder %s1256_s26, %s1025_s4  ;;  %p1769_p8 = pneg %p1258_p6 }
  0x11   : > { %s1030_s7 = scalar_lea.hbm %s1765_s1, 8192  ;;  %p1031_p11 = scmp.lt.s32.totalorder %s1256_s26, %s1765_s1 }
  0x12   : > { %p1028_p9 = pnand %p1769_p8, %p1026_p7  ;;  %p1032_p12 = scmp.lt.s32.totalorder %s1030_s7, %s1025_s4 }
  0x14   : > { %p1029_p10 = pneg %p1028_p9  ;;  %p1033_p13 = por %p1032_p12, %p1031_p11 }
  0x16   : > { %p1034_p1 = pnand %p1033_p13, %p1029_p10 }
  0x18   : > { %1037 = shalt.err (!%p1034_p1)
}
  0x19   : > { %s1038_s10 = scalar_lea.vmem %s1262_s28, 4096  ;;  %s1177_s11 = smov [#allocation5]  }
  0x1a   : > { %p1039_p2 = scmp.ne.s32.totalorder %s1262_s28, %s1038_s10  ;;  %s1043_s17 = sshll.u32 %s1177_s11, 4  ;;  %s1044_s17 = int_to_ptr.vmem [resolvable:$false] %s1043_s17 }
  0x1b   : > { %s1045_s18 = scalar_lea.vmem %s1044_s17, 8192  ;;  %p1046_p7 = scmp.lt.s32.totalorder %s1262_s28, %s1044_s17 }
  0x1c   : > { %p1041_p4 = pnand %p1039_p2, %p1769_p8  ;;  %p1047_p9 = scmp.lt.s32.totalorder %s1045_s18, %s1038_s10 }
  0x1e   : > { %p1042_p5 = pneg %p1041_p4  ;;  %p1048_p3 = por %p1047_p9, %p1046_p7 }
  0x20   : > { %p1049_p11 = pnand %p1048_p3, %p1042_p5 }
  0x22   : > { %1052 = shalt.err (!%p1049_p11)
}
  0x23   : > { %s1178_s20 = smov 512   ;;  %s1179_s22 = smov 256  }
  0x24   : > { %s1180_s23 = smov 16   ;;  %s1292_s24 = sadd.s32 4294967295, %s1175_s15  }
  0x25   : > { %966 = dma.hbm_to_vmem [thread:$0]  (!%p1258_p6), %s1256_s26, 4096, %s1262_s28, %s1264_s30, %s1178_s20, %s1179_s22, %s1180_s23  }
  0x26   : > { %s893_s25 = sadd.s32 4294967294, %s1175_s15   ;;  %p61_p3 = scmp.ne.s32.totalorder %s1167_s13, %s1163_s12 }
  0x27   : > { %p1768_p10 = scmp.eq.s32.totalorder %s1292_s24, 0  ;;  %p111_p12 = scmp.eq.s32.totalorder %s1292_s24, 1 }
  0x28   : > { %p117_p13 = scmp.eq.s32.totalorder %s893_s25, 1  ;;  %p894_p1 = scmp.ge.s32.totalorder %s1175_s15, 1 }
  0x29   : > { %p1302_p2 = por %p1768_p10, %p61_p3  ;;  %p1309_p4 = por %p111_p12, %p55_p0 }
  0x2a   : > { %p1313_p5 = por %p117_p13, %p61_p3  ;;  %p124_p7 = scmp.lt.s32.totalorder %s1175_s15, 3 }
  0x2b   : > { %s1773_s27 = scalar_select %p1302_p2, 1, 0 }
  0x2c   : > { %s1774_s26 = scalar_select %p1309_p4, 1, 0 }
  0x2d   : > { %s1775_s28 = scalar_select %p1313_p5, 1, 0 }
  0x2e   : > { %p1318_p9 = pnand %p894_p1, %p124_p7  ;;  %s1181_s5 = smov [#allocation2]  }
  0x2f   : > { %s136_s6 = sshll.u32 %s1181_s5, 4  ;;  %s900_s7 = sshll.u32 %s152_s21, 2  ;;  %s137_s6 = int_to_ptr.vmem [resolvable:$true] %s136_s6 }
  0x30   : > { %p959_p11 = pneg %p1318_p9  ;;  %s915_s8 = sshll.u32 %s1175_s15, 6 }
  0x31   : > { %s1336_s17 = scalar_lea.hbm %s1766_s2, %s915_s8  ;;  %s175_s18 = scalar_lea.vmem [#allocation7], %s900_s7 }
  0x32   : > { %p1329_p0 = pnand %p959_p11, %p1768_p10  ;;  %s183_s20 = sshll.u32 %s175_s18, 4  ;;  %s1338_s20 = int_to_ptr.vmem [resolvable:$true] %s183_s20 }
  0x33   : > { %s1064_s22 = scalar_lea.vmem %s137_s6, 2048  ;;  %p1072_p7 = scmp.lt.s32.totalorder %s137_s6, %s137_s6 }
  0x34   : > { %p1055_p3 = pneg %p1329_p0  ;;  %p1065_p12 = scmp.ne.s32.totalorder %s137_s6, %s1064_s22 }
  0x35   : > { %p1073_p11 = scmp.lt.s32.totalorder %s1064_s22, %s1064_s22 }
  0x36   : > { %p1067_p13 = pnand %p1065_p12, %p1055_p3 }
  0x37   : > { %p1074_p10 = por %p1073_p11, %p1072_p7 }
  0x38   : > { %p1068_p1 = pneg %p1067_p13 }
  0x3a   : > { %p1075_p8 = pnand %p1074_p10, %p1068_p1 }
  0x3c   : > { %1078 = shalt.err (!%p1075_p8)
}
  0x3d   : > { %s1182_s21 = smov 128   ;;  %s1183_s23 = smov 8  }
  0x3e   : > { %962 = dma.hbm_to_vmem [thread:$0]  (!%p1329_p0), %s1764_s0, 2048, %s137_s6, [#allocation3], %s1182_s21, %s1182_s21, %s1183_s23  }
  0x3f   : > { %s1079_s7 = scalar_lea.hbm %s1336_s17, 64  ;;  %p1778_p12 = pneg %p1258_p6 }
  0x40   : > { %p1080_p3 = scmp.ne.s32.totalorder %s1336_s17, %s1079_s7  ;;  %s1084_s11 = scalar_lea.hbm %s1766_s2, 128 }
  0x41   : > { %p1085_p8 = scmp.lt.s32.totalorder %s1336_s17, %s1766_s2  ;;  %p1086_p10 = scmp.lt.s32.totalorder %s1084_s11, %s1079_s7 }
  0x42   : > { %p1082_p13 = pnand %p1080_p3, %p1778_p12 }
  0x43   : > { %p1087_p1 = por %p1086_p10, %p1085_p8 }
  0x44   : > { %p1083_p7 = pneg %p1082_p13 }
  0x46   : > { %p1088_p11 = pnand %p1087_p1, %p1083_p7 }
  0x48   : > { %1091 = shalt.err (!%p1088_p11)
}
  0x49   : > { %s1092_s6 = scalar_lea.vmem %s1338_s20, 64  ;;  %p1779_p3 = pmov %p1778_p12 }
  0x4a   : > { %p1093_p0 = scmp.ne.s32.totalorder %s1338_s20, %s1092_s6  ;;  %s1184_s9 = smov [#allocation7]  }
  0x4b   : > { %s1097_s21 = sshll.u32 %s1184_s9, 4  ;;  %s1098_s21 = int_to_ptr.vmem [resolvable:$false] %s1097_s21 }
  0x4c   : > { %p1095_p12 = pnand %p1093_p0, %p1779_p3  ;;  %s1099_s23 = scalar_lea.vmem %s1098_s21, 128 }
  0x4d   : > { %p1100_p5 = scmp.lt.s32.totalorder %s1338_s20, %s1098_s21  ;;  %p1101_p4 = scmp.lt.s32.totalorder %s1099_s23, %s1092_s6 }
  0x4e   : > { %p1096_p13 = pneg %p1095_p12 }
  0x4f   : > { %p1102_p2 = por %p1101_p4, %p1100_p5 }
  0x51   : > { %p1103_p8 = pnand %p1102_p2, %p1096_p13 }
  0x53   : > { %1106 = shalt.err (!%p1103_p8)
}
  0x54   : > { %969 = dma.hbm_to_vmem [thread:$0]  (!%p1258_p6), %s1336_s17, 64, %s1338_s20, %s1264_s30  }
  0x55   : > { %192 = sbr.rel (%p1318_p9) target bundleno = 469 (0x1d5), region = 32  ;;  %p1780_p7 = scmp.eq.s32.totalorder (!%p1318_p9), %s1292_s24, 0 }
  0x5a   : > { %1150 = dma.done.wait (%p1780_p7), [#allocation3], 2048   ;;  %p1781_p10 = pmov %p1780_p7 }
  0x5b   : > { %s198_s25 = sand.u32 1, %s1292_s24   ;;  %s1378_s5 = sand.u32 1, %s1167_s13  }
  0x5c   : > { %1152 = vsyncadd (%p1781_p10), [#allocation3], 4294965248  ;;  %s905_s29 = sshll.u32 %s1378_s5, 8  ;;  %s199_s7 = scalar_lea.sflag [#allocation6], %s198_s25 }
  0x5d   : > { %s1383_s30 = scalar_lea.vmem [#allocation5], %s905_s29  ;;  %p1782_p6 = scmp.ne.s32.totalorder %s1773_s27, 0 }
  0x5f   : > { %1154 = dma.done.wait (%p1782_p6), %s199_s7, 4160  }
  0x60   : > { %1156 = vsyncadd (%p1782_p6), %s199_s7, 4294963136  ;;  %v1185_v0 = vmov 0.0   ;;  %v289_v1 = vld [vmem:[%s1383_s30 + $0xf8] sm:$0xff]  ;;  %v288_v2 = vld [vmem:[%s1383_s30 + $0xf0] sm:$0xff]  ;;  %s906_s27 = sshll.u32 %s1378_s5, 2  ;;  %s1664_s17 = scalar_lea.vmem [#allocation8], %s905_s29 }
  0x61   : > { %354 = vmatprep.mubr.f32.mxu0 %v1185_v0  ;;  %402 = vmatprep.mubr.f32.mxu1 %v1185_v0  ;;  %v287_v3 = vld [vmem:[%s1383_s30 + $0xe8] sm:$0xff]  ;;  %v286_v4 = vld [vmem:[%s1383_s30 + $0xe0] sm:$0xff]  ;;  %v285_v5 = vld [vmem:[%s1383_s30 + $0xd8] sm:$0xff]  ;;  %s211_s4 = scalar_lea.vmem [#allocation7], %s906_s27  ;;  %s916_s20 = sshll.u32 %s1292_s24, 8 }
  0x62   : > { %290 = vmatprep.subr.mxu0 %v289_v1  ;;  %917 = vmatprep.subr.mxu1 %v289_v1  ;;  %v284_v6 = vld [vmem:[%s1383_s30 + $0xd0] sm:$0xff]  ;;  %v283_v7 = vld [vmem:[%s1383_s30 + $0xc8] sm:$0xff]  ;;  %v282_v8 = vld [vmem:[%s1383_s30 + $0xc0] sm:$0xff]  ;;  %s788_s8 = sshll.u32 %s1664_s17, 4  ;;  %s1695_s11 = scalar_lea.hbm %s1767_s3, %s916_s20  ;;  %s1705_s8 = int_to_ptr.vmem [resolvable:$true] %s788_s8 }
  0x63   : > { %291 = vmatpush1.msra.mxu0 %v288_v2  ;;  %933 = vmatpush1.msra.mxu1 %v288_v2  ;;  %v281_v9 = vld [vmem:[%s1383_s30 + $0xb8] sm:$0xff]  ;;  %v280_v10 = vld [vmem:[%s1383_s30 + $0xb0] sm:$0xff]  ;;  %v279_v11 = vld [vmem:[%s1383_s30 + $0xa8] sm:$0xff]  ;;  %s775_s18 = scalar_lea.sflag [#allocation4], %s1378_s5  ;;  %s1107_s22 = scalar_lea.vmem %s1705_s8, 4096 }
  0x64   : > { %292 = vmatprep.subr.mxu0 %v287_v3  ;;  %918 = vmatprep.subr.mxu1 %v287_v3  ;;  %v278_v12 = vld [vmem:[%s1383_s30 + $0xa0] sm:$0xff]  ;;  %v277_v13 = vld [vmem:[%s1383_s30 + $0x98] sm:$0xff]  ;;  %v276_v14 = vld [vmem:[%s1383_s30 + $0x90] sm:$0xff]  ;;  %p1108_p2 = scmp.ne.s32.totalorder %s1705_s8, %s1107_s22  ;;  %p1783_p4 = scmp.ne.s32.totalorder %s1774_s26, 0 }
  0x65   : > { %293 = vmatpush1.msra.mxu0 %v286_v4  ;;  %934 = vmatpush1.msra.mxu1 %v286_v4  ;;  %v275_v15 = vld [vmem:[%s1383_s30 + $0x88] sm:$0xff]  ;;  %v274_v16 = vld [vmem:[%s1383_s30 + $0x80] sm:$0xff]  ;;  %v273_v17 = vld [vmem:[%s1383_s30 + $0x78] sm:$0xff]  ;;  %s1187_s6 = smov [#allocation8]  }
  0x66   : > { %294 = vmatprep.subr.mxu0 %v285_v5  ;;  %919 = vmatprep.subr.mxu1 %v285_v5  ;;  %v272_v18 = vld [vmem:[%s1383_s30 + $0x70] sm:$0xff]  ;;  %v271_v19 = vld [vmem:[%s1383_s30 + $0x68] sm:$0xff]  ;;  %v270_v20 = vld [vmem:[%s1383_s30 + $0x60] sm:$0xff]  ;;  %p1109_p5 = pnand %p1108_p2, %p1783_p4  ;;  %s1111_s9 = sshll.u32 %s1187_s6, 4  ;;  %s1112_s9 = int_to_ptr.vmem [resolvable:$false] %s1111_s9 }
  0x67   : > { %295 = vmatpush1.msra.mxu0 %v284_v6  ;;  %935 = vmatpush1.msra.mxu1 %v284_v6  ;;  %v269_v21 = vld [vmem:[%s1383_s30 + $0x58] sm:$0xff]  ;;  %v268_v22 = vld [vmem:[%s1383_s30 + $0x50] sm:$0xff]  ;;  %v267_v23 = vld [vmem:[%s1383_s30 + $0x48] sm:$0xff]  ;;  %s1113_s21 = scalar_lea.vmem %s1112_s9, 8192  ;;  %p1114_p1 = scmp.lt.s32.totalorder %s1705_s8, %s1112_s9 }
  0x68   : > { %296 = vmatprep.subr.mxu0 %v283_v7  ;;  %920 = vmatprep.subr.mxu1 %v283_v7  ;;  %v266_v24 = vld [vmem:[%s1383_s30 + $0x40] sm:$0xff]  ;;  %v265_v25 = vld [vmem:[%s1383_s30 + $0x38] sm:$0xff]  ;;  %v264_v26 = vld [vmem:[%s1383_s30 + $0x30] sm:$0xff]  ;;  %p1110_p9 = pneg %p1109_p5  ;;  %p1115_p11 = scmp.lt.s32.totalorder %s1113_s21, %s1107_s22 }
  0x69   : > { %297 = vmatpush1.msra.mxu0 %v282_v8  ;;  %936 = vmatpush1.msra.mxu1 %v282_v8  ;;  %v263_v27 = vld [vmem:[%s1383_s30 + $0x28] sm:$0xff]  ;;  %v262_v28 = vld [vmem:[%s1383_s30 + $0x20] sm:$0xff]  ;;  %v261_v29 = vld [vmem:[%s1383_s30 + $0x18] sm:$0xff] }
  0x6a   : > { %298 = vmatprep.subr.mxu0 %v281_v9  ;;  %921 = vmatprep.subr.mxu1 %v281_v9  ;;  %v260_v30 = vld [vmem:[%s1383_s30 + $0x10] sm:$0xff]  ;;  %v259_v31 = vld [vmem:[%s1383_s30 + $0x8] sm:$0xff]  ;;  %v258_v32 = vld [vmem:[%s1383_s30] sm:$0xff]  ;;  %p1116_p0 = por %p1115_p11, %p1114_p1 }
  0x6b   : > { %299 = vmatpush1.msra.mxu0 %v280_v10  ;;  %937 = vmatpush1.msra.mxu1 %v280_v10  ;;  %v242_v33 = vld [vmem:[#allocation2] sm:$0xff]  ;;  %v243_v35 = vld [vmem:[#allocation2 + $0x8] sm:$0xff]  ;;  %v244_v37 = vld [vmem:[#allocation2 + $0x10] sm:$0xff] }
  0x6c   : > { %300 = vmatprep.subr.mxu0 %v279_v11  ;;  %922 = vmatprep.subr.mxu1 %v279_v11  ;;  %v250_v34 = vld [vmem:[#allocation2 + $0x40] sm:$0xff]  ;;  %v251_v36 = vld [vmem:[#allocation2 + $0x48] sm:$0xff]  ;;  %v252_v38 = vld [vmem:[#allocation2 + $0x50] sm:$0xff]  ;;  %p1117_p3 = pnand %p1116_p0, %p1110_p9 }
  0x6d   : > { %301 = vmatpush1.msra.mxu0 %v278_v12  ;;  %938 = vmatpush1.msra.mxu1 %v278_v12  ;;  %v245_v39 = vld [vmem:[#allocation2 + $0x18] sm:$0xff]  ;;  %v246_v41 = vld [vmem:[#allocation2 + $0x20] sm:$0xff]  ;;  %v247_v43 = vld [vmem:[#allocation2 + $0x28] sm:$0xff] }
  0x6e   : > { %302 = vmatprep.subr.mxu0 %v277_v13  ;;  %923 = vmatprep.subr.mxu1 %v277_v13  ;;  %v253_v40 = vld [vmem:[#allocation2 + $0x58] sm:$0xff]  ;;  %v254_v42 = vld [vmem:[#allocation2 + $0x60] sm:$0xff]  ;;  %v255_v44 = vld [vmem:[#allocation2 + $0x68] sm:$0xff] }
  0x6f   : > { %303 = vmatpush1.msra.mxu0 %v276_v14  ;;  %939 = vmatpush1.msra.mxu1 %v276_v14  ;;  %v248_v45 = vld [vmem:[#allocation2 + $0x30] sm:$0xff]  ;;  %v249_v47 = vld [vmem:[#allocation2 + $0x38] sm:$0xff] }
  0x70   : > { %304 = vmatprep.subr.mxu0 %v275_v15  ;;  %924 = vmatprep.subr.mxu1 %v275_v15  ;;  %v256_v46 = vld [vmem:[#allocation2 + $0x70] sm:$0xff]  ;;  %v257_v48 = vld [vmem:[#allocation2 + $0x78] sm:$0xff] }
  0x71   : > { %305 = vmatpush1.msra.mxu0 %v274_v16  ;;  %940 = vmatpush1.msra.mxu1 %v274_v16 }
  0x72   : > { %306 = vmatprep.subr.mxu0 %v273_v17  ;;  %925 = vmatprep.subr.mxu1 %v273_v17 }
  0x73   : > { %307 = vmatpush1.msra.mxu0 %v272_v18  ;;  %941 = vmatpush1.msra.mxu1 %v272_v18 }
  0x74   : > { %308 = vmatprep.subr.mxu0 %v271_v19  ;;  %926 = vmatprep.subr.mxu1 %v271_v19 }
  0x75   : > { %309 = vmatpush1.msra.mxu0 %v270_v20  ;;  %942 = vmatpush1.msra.mxu1 %v270_v20 }
  0x76   : > { %310 = vmatprep.subr.mxu0 %v269_v21  ;;  %927 = vmatprep.subr.mxu1 %v269_v21 }
  0x77   : > { %311 = vmatpush1.msra.mxu0 %v268_v22  ;;  %943 = vmatpush1.msra.mxu1 %v268_v22 }
  0x78   : > { %312 = vmatprep.subr.mxu0 %v267_v23  ;;  %928 = vmatprep.subr.mxu1 %v267_v23 }
  0x79   : > { %313 = vmatpush1.msra.mxu0 %v266_v24  ;;  %944 = vmatpush1.msra.mxu1 %v266_v24 }
  0x7a   : > { %314 = vmatprep.subr.mxu0 %v265_v25  ;;  %929 = vmatprep.subr.mxu1 %v265_v25 }
  0x7b   : > { %315 = vmatpush1.msra.mxu0 %v264_v26  ;;  %945 = vmatpush1.msra.mxu1 %v264_v26 }
  0x7c   : > { %316 = vmatprep.subr.mxu0 %v263_v27  ;;  %930 = vmatprep.subr.mxu1 %v263_v27 }
  0x7d   : > { %317 = vmatpush1.msra.mxu0 %v262_v28  ;;  %946 = vmatpush1.msra.mxu1 %v262_v28 }
  0x7e   : > { %318 = vmatprep.subr.mxu0 %v261_v29  ;;  %931 = vmatprep.subr.mxu1 %v261_v29 }
  0x7f   : > { %319 = vmatpush1.msra.mxu0 %v260_v30  ;;  %947 = vmatpush1.msra.mxu1 %v260_v30 }
  0x80   : > { %320 = vmatprep.subr.mxu0 %v259_v31  ;;  %932 = vmatprep.subr.mxu1 %v259_v31 }
  0x81   : > { %321 = vmatpush1.msra.mxu0 %v258_v32  ;;  %948 = vmatpush1.msra.mxu1 %v258_v32 }
  0x82   : > { %355 = vmatmul.mubr.f32.vlgmr.msra.gmra.mxu0 %v242_v33  ;;  %403 = vmatmul.mubr.f32.vlgmr.msra.gmra.mxu1 %v250_v34 }
  0x83   : > { %360 = vmatprep.mubr.f32.mxu0 %v1185_v0  ;;  %408 = vmatprep.mubr.f32.mxu1 %v1185_v0 }
  0x86   : > { %361 = vmatmul.mubr.f32.gmra.mxu0 %v243_v35  ;;  %409 = vmatmul.mubr.f32.gmra.mxu1 %v251_v36 }
  0x87   : > { %366 = vmatprep.mubr.f32.mxu0 %v1185_v0  ;;  %414 = vmatprep.mubr.f32.mxu1 %v1185_v0 }
  0x8a   : > { %367 = vmatmul.mubr.f32.gmra.mxu0 %v244_v37  ;;  %415 = vmatmul.mubr.f32.gmra.mxu1 %v252_v38 }
  0x8b   : > { %372 = vmatprep.mubr.f32.mxu0 %v1185_v0  ;;  %420 = vmatprep.mubr.f32.mxu1 %v1185_v0 }
  0x8e   : > { %373 = vmatmul.mubr.f32.gmra.mxu0 %v245_v39  ;;  %421 = vmatmul.mubr.f32.gmra.mxu1 %v253_v40 }
  0x8f   : > { %378 = vmatprep.mubr.f32.mxu0 %v1185_v0  ;;  %426 = vmatprep.mubr.f32.mxu1 %v1185_v0 }
  0x92   : > { %379 = vmatmul.mubr.f32.gmra.mxu0 %v246_v41  ;;  %427 = vmatmul.mubr.f32.gmra.mxu1 %v254_v42 }
  0x93   : > { %384 = vmatprep.mubr.f32.mxu0 %v1185_v0  ;;  %432 = vmatprep.mubr.f32.mxu1 %v1185_v0 }
  0x96   : > { %385 = vmatmul.mubr.f32.gmra.mxu0 %v247_v43  ;;  %433 = vmatmul.mubr.f32.gmra.mxu1 %v255_v44 }
  0x97   : > { %390 = vmatprep.mubr.f32.mxu0 %v1185_v0  ;;  %438 = vmatprep.mubr.f32.mxu1 %v1185_v0 }
  0x9a   : > { %391 = vmatmul.mubr.f32.gmra.mxu0 %v248_v45  ;;  %439 = vmatmul.mubr.f32.gmra.mxu1 %v256_v46 }
  0x9b   : > { %396 = vmatprep.mubr.f32.mxu0 %v1185_v0  ;;  %444 = vmatprep.mubr.f32.mxu1 %v1185_v0 }
  0x9e   : > { %397 = vmatmul.mubr.f32.gmra.mxu0 %v249_v47  ;;  %445 = vmatmul.mubr.f32.gmra.mxu1 %v257_v48 }
 0x142   : > { %v1437_v49 = vpop.f32.mrf.mxu0  ;;  %v1439_v50 = vpop.f32.mrf.mxu1 }
 0x143   : > { %v493_v5 = vmul.f32 %v1437_v49, %v1437_v49 }
 0x144   : > { %v1441_v51 = vpop.f32.mrf.mxu0  ;;  %v1443_v52 = vpop.f32.mrf.mxu1 }
 0x145   : > { %v494_v8 = vmul.f32 %v1441_v51, %v1441_v51 }
 0x146   : > { %v1445_v53 = vpop.f32.mrf.mxu0  ;;  %v1447_v54 = vpop.f32.mrf.mxu1 }
 0x147   : > { %v495_v1 = vmul.f32 %v1445_v53, %v1445_v53  ;;  %v451_v6 = vadd.f32 %v1445_v53, %v1437_v49 }
 0x148   : > { %v1449_v55 = vpop.f32.mrf.mxu0  ;;  %v1451_v56 = vpop.f32.mrf.mxu1 }
 0x149   : > { %v496_v2 = vmul.f32 %v1449_v55, %v1449_v55  ;;  %v525_v11 = vadd.f32 %v495_v1, %v493_v5  ;;  %v472_v12 = vadd.f32 %v1449_v55, %v1441_v51  ;;  %v509_v5 = vmul.f32 %v1439_v50, %v1439_v50 }
 0x14a   : > { %v1453_v57 = vpop.f32.mrf.mxu0  ;;  %v1455_v58 = vpop.f32.mrf.mxu1 }
 0x14b   : > { %v497_v7 = vmul.f32 %v1453_v57, %v1453_v57  ;;  %v452_v13 = vadd.f32 %v451_v6, %v1453_v57  ;;  %v546_v16 = vadd.f32 %v496_v2, %v494_v8 }
 0x14c   : > { %v1457_v59 = vpop.f32.mrf.mxu0  ;;  %v1459_v60 = vpop.f32.mrf.mxu1 }
 0x14d   : > { %v498_v9 = vmul.f32 %v1457_v59, %v1457_v59  ;;  %v526_v19 = vadd.f32 %v525_v11, %v497_v7  ;;  %v473_v20 = vadd.f32 %v472_v12, %v1457_v59 }
 0x14e   : > { %v1461_v61 = vpop.f32.mrf.mxu0  ;;  %v1463_v62 = vpop.f32.mrf.mxu1 }
 0x14f   : > { %v499_v14 = vmul.f32 %v1461_v61, %v1461_v61  ;;  %v453_v21 = vadd.f32 %v452_v13, %v1461_v61  ;;  %v547_v23 = vadd.f32 %v546_v16, %v498_v9  ;;  %v511_v16 = vmul.f32 %v1447_v54, %v1447_v54 }
 0x150   : > { %v1465_v63 = vpop.f32.mrf.mxu0  ;;  %v1467_v0 = vpop.f32.mrf.mxu1 }
 0x151   : > { %v500_v17 = vmul.f32 %v1465_v63, %v1465_v63  ;;  %v527_v26 = vadd.f32 %v526_v19, %v499_v14  ;;  %v474_v27 = vadd.f32 %v473_v20, %v1465_v63  ;;  %v510_v14 = vmul.f32 %v1443_v52, %v1443_v52 }
 0x152   : > { %v1473_v3 = vpop.f32.mrf.mxu0  ;;  %v1475_v4 = vpop.f32.mrf.mxu1 }
 0x153   : > { %v501_v22 = vmul.f32 %v1473_v3, %v1473_v3  ;;  %v454_v28 = vadd.f32 %v453_v21, %v1473_v3  ;;  %v548_v31 = vadd.f32 %v547_v23, %v500_v17  ;;  %v513_v23 = vmul.f32 %v1455_v58, %v1455_v58 }
 0x154   : > { %v1487_v10 = vpop.f32.mrf.mxu0  ;;  %v1494_v15 = vpop.f32.mrf.mxu1 }
 0x155   : > { %v502_v24 = vmul.f32 %v1487_v10, %v1487_v10  ;;  %v528_v34 = vadd.f32 %v527_v26, %v501_v22  ;;  %v475_v35 = vadd.f32 %v474_v27, %v1487_v10  ;;  %v512_v22 = vmul.f32 %v1451_v56, %v1451_v56 }
 0x156   : > { %v1498_v18 = vpop.f32.mrf.mxu0  ;;  %v1512_v30 = vpop.f32.mrf.mxu1 }
 0x157   : > { %v503_v29 = vmul.f32 %v1498_v18, %v1498_v18  ;;  %v455_v36 = vadd.f32 %v454_v28, %v1498_v18  ;;  %v549_v38 = vadd.f32 %v548_v31, %v502_v24  ;;  %v514_v31 = vmul.f32 %v1459_v60, %v1459_v60 }
 0x158   : > { %v1506_v25 = vpop.f32.mrf.mxu0  ;;  %v1528_v44 = vpop.f32.mrf.mxu1 }
 0x159   : > { %v504_v32 = vmul.f32 %v1506_v25, %v1506_v25  ;;  %v529_v40 = vadd.f32 %v528_v34, %v503_v29  ;;  %v476_v41 = vadd.f32 %v475_v35, %v1506_v25 }
 0x15a   : > { %v1516_v33 = vpop.f32.mrf.mxu0  ;;  %v1544_v13 = vpop.f32.mrf.mxu1 }
 0x15b   : > { %v505_v37 = vmul.f32 %v1516_v33, %v1516_v33  ;;  %v456_v42 = vadd.f32 %v455_v36, %v1516_v33  ;;  %v550_v45 = vadd.f32 %v549_v38, %v504_v32  ;;  %v515_v32 = vmul.f32 %v1463_v62, %v1463_v62 }
 0x15c   : > { %v1522_v39 = vpop.f32.mrf.mxu0  ;;  %v1558_v29 = vpop.f32.mrf.mxu1  ;;  %v516_v38 = vmul.f32 %v1467_v0, %v1467_v0 }
 0x15d   : > { %v506_v43 = vmul.f32 %v1522_v39, %v1522_v39  ;;  %v530_v47 = vadd.f32 %v529_v40, %v505_v37  ;;  %v477_v48 = vadd.f32 %v476_v41, %v1522_v39  ;;  %v517_v40 = vmul.f32 %v1475_v4, %v1475_v4 }
 0x15e   : > { %v1530_v46 = vpop.f32.mrf.mxu0 }
 0x15f   : > { %v457_v1 = vadd.f32 %v456_v42, %v1530_v46  ;;  %v507_v2 = vmul.f32 %v1530_v46, %v1530_v46  ;;  %v551_v6 = vadd.f32 %v550_v45, %v506_v43 }
 0x160   : > { %v1538_v7 = vpop.f32.mrf.mxu0 }
 0x161   : > { %v458_v8 = vadd.f32 %v457_v1, %v1439_v50  ;;  %v531_v9 = vadd.f32 %v530_v47, %v507_v2  ;;  %v478_v11 = vadd.f32 %v477_v48, %v1538_v7  ;;  %v508_v12 = vmul.f32 %v1538_v7, %v1538_v7  ;;  %v1572_v47 = vpop.f32.mrf.mxu1 }
 0x162   : > { %v518_v48 = vmul.f32 %v1494_v15, %v1494_v15  ;;  %v519_v1 = vmul.f32 %v1512_v30, %v1512_v30 }
 0x163   : > { %v459_v17 = vadd.f32 %v458_v8, %v1447_v54  ;;  %v532_v19 = vadd.f32 %v531_v9, %v509_v5  ;;  %v479_v20 = vadd.f32 %v478_v11, %v1443_v52  ;;  %v552_v21 = vadd.f32 %v551_v6, %v508_v12 }
 0x164   : > { %v520_v9 = vmul.f32 %v1528_v44, %v1528_v44  ;;  %v521_v11 = vmul.f32 %v1544_v13, %v1544_v13  ;;  %v523_v12 = vmul.f32 %v1572_v47, %v1572_v47 }
 0x165   : > { %v533_v24 = vadd.f32 %v532_v19, %v511_v16  ;;  %v480_v26 = vadd.f32 %v479_v20, %v1451_v56  ;;  %v553_v27 = vadd.f32 %v552_v21, %v510_v14  ;;  %v460_v28 = vadd.f32 %v459_v17, %v1455_v58  ;;  %v1588_v20 = vpop.f32.mrf.mxu1 }
 0x166   : > { %v522_v21 = vmul.f32 %v1558_v29, %v1558_v29 }
 0x167   : > { %v554_v34 = vadd.f32 %v553_v27, %v512_v22  ;;  %v461_v35 = vadd.f32 %v460_v28, %v1463_v62  ;;  %v534_v36 = vadd.f32 %v533_v24, %v513_v23  ;;  %v481_v37 = vadd.f32 %v480_v26, %v1459_v60 }
 0x168   : > { %v524_v27 = vmul.f32 %v1588_v20, %v1588_v20 }
 0x169   : > { %v462_v41 = vadd.f32 %v461_v35, %v1475_v4  ;;  %v535_v42 = vadd.f32 %v534_v36, %v515_v32  ;;  %v482_v43 = vadd.f32 %v481_v37, %v1467_v0  ;;  %v555_v45 = vadd.f32 %v554_v34, %v514_v31 }
 0x16b   : > { %v536_v2 = vadd.f32 %v535_v42, %v517_v40  ;;  %v483_v5 = vadd.f32 %v482_v43, %v1494_v15  ;;  %v556_v6 = vadd.f32 %v555_v45, %v516_v38  ;;  %v463_v8 = vadd.f32 %v462_v41, %v1512_v30 }
 0x16d   : > { %v557_v14 = vadd.f32 %v556_v6, %v518_v48  ;;  %v537_v16 = vadd.f32 %v536_v2, %v519_v1  ;;  %v484_v17 = vadd.f32 %v483_v5, %v1528_v44  ;;  %v464_v19 = vadd.f32 %v463_v8, %v1544_v13 }
 0x16f   : > { %v558_v22 = vadd.f32 %v557_v14, %v520_v9  ;;  %v538_v23 = vadd.f32 %v537_v16, %v521_v11  ;;  %v485_v24 = vadd.f32 %v484_v17, %v1558_v29  ;;  %v465_v26 = vadd.f32 %v464_v19, %v1572_v47 }
 0x171   : > { %v559_v28 = vadd.f32 %v558_v22, %v522_v21  ;;  %v466_v31 = vrot.slane %v465_v26, 4  ;;  %v539_v32 = vadd.f32 %v538_v23, %v523_v12  ;;  %v486_v34 = vadd.f32 %v485_v24, %v1588_v20 }
 0x173   : > { %v467_v35 = vadd.f32 %v466_v31, %v465_v26  ;;  %v540_v36 = vrot.slane %v539_v32, 4  ;;  %v487_v37 = vrot.slane %v486_v34, 4  ;;  %v560_v38 = vadd.f32 %v559_v28, %v524_v27 }
 0x175   : > { %v468_v40 = vrot.slane %v467_v35, 2  ;;  %v541_v41 = vadd.f32 %v540_v36, %v539_v32  ;;  %v488_v42 = vadd.f32 %v487_v37, %v486_v34  ;;  %v561_v43 = vrot.slane %v560_v38, 4 }
 0x177   : > { %v469_v45 = vadd.f32 %v468_v40, %v467_v35  ;;  %v542_v48 = vrot.slane %v541_v41, 2  ;;  %v489_v1 = vrot.slane %v488_v42, 2  ;;  %v562_v2 = vadd.f32 %v561_v43, %v560_v38 }
 0x178   : > { %v1186_v40 = vmov 1966171168  }
 0x179   : > { %v470_v5 = vrot.slane %v469_v45, 1  ;;  %v543_v6 = vadd.f32 %v542_v48, %v541_v41  ;;  %v490_v8 = vadd.f32 %v489_v1, %v488_v42  ;;  %v563_v9 = vrot.slane %v562_v2, 2 }
 0x17a   : > { %v588_v41 = vunpack.c.l.s4 %v1186_v40  ;;  %v590_v42 = vlaneseq }
 0x17b   : > { %v471_v11 = vadd.f32 %v470_v5, %v469_v45  ;;  %v544_v12 = vrot.slane %v543_v6, 1  ;;  %v491_v14 = vrot.slane %v490_v8, 1  ;;  %v564_v16 = vadd.f32 %v563_v9, %v562_v2 }
 0x17c   : > { %v589_v43 = vunpack.c.0.s8 %v588_v41  ;;  %v591_v45 = vshrl.u32 %v590_v42, 7 }
 0x17d   : > { %v545_v17 = vadd.f32 %v544_v12, %v543_v6  ;;  %v567_v19 = vmul.f32 0.0078125, %v471_v11  ;;  %v492_v21 = vadd.f32 %v491_v14, %v490_v8  ;;  %v565_v22 = vrot.slane %v564_v16, 1  ;;  %v577_v8 = vld [vmem:[%s211_s4] ss:$2 sm:$0x3] }
 0x17e   : > { %v592_v1 = vsub.s32 %v589_v43, %v591_v45  ;;  %v606_v11 = vsub.s32 0, %v591_v45  ;;  %v610_v12 = vsub.s32 1, %v591_v45 }
 0x17f   : > { %v569_v23 = vmul.f32 0.0078125, %v545_v17  ;;  %v571_v24 = vmul.f32 %v567_v19, %v567_v19  ;;  %v566_v26 = vadd.f32 %v565_v22, %v564_v16  ;;  %v568_v27 = vmul.f32 0.0078125, %v492_v21 }
 0x181   : > { %v573_v28 = vsub.f32 %v569_v23, %v571_v24  ;;  %v570_v31 = vmul.f32 0.0078125, %v566_v26  ;;  %v572_v32 = vmul.f32 %v568_v27, %v568_v27 }
 0x183   : > { %v575_v34 = vmax.f32 %v573_v28, 0.0  ;;  %v574_v35 = vsub.f32 %v570_v31, %v572_v32 }
 0x185   : > { %v580_v36 = vadd.f32 1e-05, %v575_v34  ;;  %v576_v37 = vmax.f32 %v574_v35, 0.0 }
 0x187   : > { %v581_v38 = vadd.f32 1e-05, %v576_v37  ;;  %1021 = vrsqrt.f32 %v580_v36 }
 0x189   : > { %1023 = vrsqrt.f32 %v581_v38 }
 0x194   : > { %v1022_v48 = vpop.eup %1021 }
 0x196   : > { %v1024_v2 = vpop.eup %1023 }
 0x197   : > { %v586_v5 = vcombine.low %v1022_v48, %v1024_v2 }
 0x199   : > { %v593_v6 = vrot.slane %v586_v5, %v592_v1 }
 0x19b   : > { %v600_v9 = vrot.slane %v593_v6, %v592_v1 }
 0x19d   : > { %v602_v14 = vmul.f32 %v600_v9, %v577_v8 }
 0x19f   : > { %v607_v16 = vrot.slane %v602_v14, %v606_v11  ;;  %v611_v17 = vrot.slane %v602_v14, %v610_v12 }
 0x1a1   : > { %v614_v21 = vmul.f32 %v607_v16, %v567_v19  ;;  %v615_v22 = vmul.f32 %v611_v17, %v568_v27  ;;  %v635_v24 = vmul.f32 %v607_v16, %v1437_v49  ;;  %v636_v26 = vmul.f32 %v611_v17, %v1441_v51  ;;  %v908_v19 = vld [vmem:[%s211_s4 + $0x1] ss:$2 sm:$0x3] }
 0x1a2   : > { %v637_v28 = vmul.f32 %v607_v16, %v1445_v53  ;;  %v638_v31 = vmul.f32 %v611_v17, %v1449_v55  ;;  %v639_v32 = vmul.f32 %v607_v16, %v1453_v57  ;;  %v640_v35 = vmul.f32 %v611_v17, %v1457_v59 }
 0x1a3   : > { %v618_v23 = vcombine.low %v614_v21, %v615_v22  ;;  %v641_v36 = vmul.f32 %v607_v16, %v1461_v61  ;;  %v642_v37 = vmul.f32 %v611_v17, %v1465_v63  ;;  %v643_v27 = vmul.f32 %v607_v16, %v1473_v3 }
 0x1a4   : > { %v644_v49 = vmul.f32 %v611_v17, %v1487_v10  ;;  %v645_v51 = vmul.f32 %v607_v16, %v1498_v18  ;;  %v646_v53 = vmul.f32 %v611_v17, %v1506_v25  ;;  %v647_v55 = vmul.f32 %v607_v16, %v1516_v33 }
 0x1a5   : > { %v625_v34 = vrot.slane %v618_v23, %v592_v1  ;;  %v648_v57 = vmul.f32 %v611_v17, %v1522_v39  ;;  %v649_v59 = vmul.f32 %v607_v16, %v1530_v46  ;;  %v650_v61 = vmul.f32 %v611_v17, %v1538_v7 }
 0x1a6   : > { %v651_v63 = vmul.f32 %v607_v16, %v1439_v50  ;;  %v652_v40 = vmul.f32 %v611_v17, %v1443_v52  ;;  %v653_v3 = vmul.f32 %v607_v16, %v1447_v54  ;;  %v654_v18 = vmul.f32 %v611_v17, %v1451_v56 }
 0x1a7   : > { %v632_v38 = vrot.slane %v625_v34, %v592_v1  ;;  %v655_v25 = vmul.f32 %v607_v16, %v1455_v58  ;;  %v656_v41 = vmul.f32 %v611_v17, %v1459_v60  ;;  %v657_v33 = vmul.f32 %v607_v16, %v1463_v62 }
 0x1a8   : > { %v658_v39 = vmul.f32 %v611_v17, %v1467_v0  ;;  %v659_v46 = vmul.f32 %v607_v16, %v1475_v4  ;;  %v660_v7 = vmul.f32 %v611_v17, %v1494_v15  ;;  %v661_v50 = vmul.f32 %v607_v16, %v1512_v30 }
 0x1a9   : > { %v634_v10 = vsub.f32 %v908_v19, %v632_v38  ;;  %v662_v52 = vmul.f32 %v611_v17, %v1528_v44  ;;  %v663_v56 = vmul.f32 %v607_v16, %v1544_v13  ;;  %v664_v58 = vmul.f32 %v611_v17, %v1558_v29 }
 0x1aa   : > { %v665_v60 = vmul.f32 %v607_v16, %v1572_v47  ;;  %v666_v62 = vmul.f32 %v611_v17, %v1588_v20 }
 0x1ab   : > { %v671_v54 = vrot.slane %v634_v10, %v606_v11  ;;  %v675_v42 = vrot.slane %v634_v10, %v610_v12 }
 0x1ad   : > { %v678_v43 = vadd.f32 %v671_v54, %v635_v24  ;;  %v679_v0 = vadd.f32 %v675_v42, %v636_v26  ;;  %v680_v45 = vadd.f32 %v671_v54, %v637_v28  ;;  %v681_v4 = vadd.f32 %v675_v42, %v638_v31 }
 0x1ae   : > { %v682_v48 = vadd.f32 %v671_v54, %v639_v32  ;;  %v683_v15 = vadd.f32 %v675_v42, %v640_v35  ;;  %v684_v1 = vadd.f32 %v671_v54, %v641_v36  ;;  %v685_v30 = vadd.f32 %v675_v42, %v642_v37 }
 0x1af   : > { %v686_v2 = vadd.f32 %v671_v54, %v643_v27  ;;  %v687_v44 = vadd.f32 %v675_v42, %v644_v49  ;;  %v688_v5 = vadd.f32 %v671_v54, %v645_v51  ;;  %v689_v6 = vadd.f32 %v675_v42, %v646_v53 }
 0x1b0   : > { %v690_v8 = vadd.f32 %v671_v54, %v647_v55  ;;  %v691_v13 = vadd.f32 %v675_v42, %v648_v57  ;;  %v692_v9 = vadd.f32 %v671_v54, %v649_v59  ;;  %v693_v29 = vadd.f32 %v675_v42, %v650_v61 }
 0x1b1   : > { %v1630_v11 = vadd.f32 %v671_v54, %v651_v63  ;;  %v1632_v47 = vadd.f32 %v675_v42, %v652_v40  ;;  %v1634_v20 = vadd.f32 %v671_v54, %v653_v3  ;;  %v1636_v12 = vadd.f32 %v675_v42, %v654_v18 }
 0x1b2   : > { %v1638_v14 = vadd.f32 %v671_v54, %v655_v25  ;;  %v1640_v16 = vadd.f32 %v675_v42, %v656_v41  ;;  %v1642_v17 = vadd.f32 %v671_v54, %v657_v33  ;;  %v1644_v21 = vadd.f32 %v675_v42, %v658_v39 }
 0x1b3   : > { %v1646_v22 = vadd.f32 %v671_v54, %v659_v46  ;;  %v1648_v23 = vadd.f32 %v675_v42, %v660_v7  ;;  %v1650_v24 = vadd.f32 %v671_v54, %v661_v50  ;;  %v1652_v26 = vadd.f32 %v675_v42, %v662_v52 }
 0x1b4   : > { %v1654_v28 = vadd.f32 %v671_v54, %v663_v56  ;;  %v1656_v31 = vadd.f32 %v675_v42, %v664_v58  ;;  %v1658_v32 = vadd.f32 %v671_v54, %v665_v60  ;;  %v1660_v34 = vadd.f32 %v675_v42, %v666_v62 }
 0x1b5   : > { %v710_v35 = vmax.f32 %v678_v43, 0.0  ;;  %v711_v36 = vmax.f32 %v679_v0, 0.0  ;;  %v712_v37 = vmax.f32 %v680_v45, 0.0  ;;  %v713_v19 = vmax.f32 %v681_v4, 0.0 }
 0x1b6   : > { %v714_v27 = vmax.f32 %v682_v48, 0.0  ;;  %v715_v49 = vmax.f32 %v683_v15, 0.0  ;;  %v716_v51 = vmax.f32 %v684_v1, 0.0  ;;  %v717_v53 = vmax.f32 %v685_v30, 0.0 }
 0x1b7   : > { %v718_v38 = vmax.f32 %v686_v2, 0.0  ;;  %v719_v55 = vmax.f32 %v687_v44, 0.0  ;;  %v720_v57 = vmax.f32 %v688_v5, 0.0  ;;  %v721_v59 = vmax.f32 %v689_v6, 0.0  ;;  %742 = vst [vmem:[%s1664_s17] sm:$0xff] %v710_v35  ;;  %743 = vst [vmem:[%s1664_s17 + $0x8] sm:$0xff] %v711_v36 }
 0x1b8   : > { %744 = vst [vmem:[%s1664_s17 + $0x10] sm:$0xff] %v712_v37  ;;  %745 = vst [vmem:[%s1664_s17 + $0x18] sm:$0xff] %v713_v19  ;;  %v722_v61 = vmax.f32 %v690_v8, 0.0  ;;  %v723_v63 = vmax.f32 %v691_v13, 0.0  ;;  %v724_v40 = vmax.f32 %v692_v9, 0.0  ;;  %v725_v3 = vmax.f32 %v693_v29, 0.0 }
 0x1b9   : > { %746 = vst [vmem:[%s1664_s17 + $0x20] sm:$0xff] %v714_v27  ;;  %747 = vst [vmem:[%s1664_s17 + $0x28] sm:$0xff] %v715_v49  ;;  %v726_v10 = vmax.f32 %v1630_v11, 0.0  ;;  %v727_v18 = vmax.f32 %v1632_v47, 0.0  ;;  %v728_v25 = vmax.f32 %v1634_v20, 0.0  ;;  %v729_v41 = vmax.f32 %v1636_v12, 0.0 }
 0x1ba   : > { %748 = vst [vmem:[%s1664_s17 + $0x30] sm:$0xff] %v716_v51  ;;  %749 = vst [vmem:[%s1664_s17 + $0x38] sm:$0xff] %v717_v53  ;;  %v730_v33 = vmax.f32 %v1638_v14, 0.0  ;;  %v731_v39 = vmax.f32 %v1640_v16, 0.0  ;;  %v732_v46 = vmax.f32 %v1642_v17, 0.0  ;;  %v733_v7 = vmax.f32 %v1644_v21, 0.0 }
 0x1bb   : > { %750 = vst [vmem:[%s1664_s17 + $0x40] sm:$0xff] %v718_v38  ;;  %751 = vst [vmem:[%s1664_s17 + $0x48] sm:$0xff] %v719_v55  ;;  %v734_v50 = vmax.f32 %v1646_v22, 0.0  ;;  %v735_v52 = vmax.f32 %v1648_v23, 0.0  ;;  %v736_v54 = vmax.f32 %v1650_v24, 0.0  ;;  %v737_v42 = vmax.f32 %v1652_v26, 0.0 }
 0x1bc   : > { %752 = vst [vmem:[%s1664_s17 + $0x50] sm:$0xff] %v720_v57  ;;  %753 = vst [vmem:[%s1664_s17 + $0x58] sm:$0xff] %v721_v59  ;;  %v738_v56 = vmax.f32 %v1654_v28, 0.0  ;;  %v739_v58 = vmax.f32 %v1656_v31, 0.0  ;;  %v740_v60 = vmax.f32 %v1658_v32, 0.0  ;;  %v741_v62 = vmax.f32 %v1660_v34, 0.0 }
 0x1bd   : > { %754 = vst [vmem:[%s1664_s17 + $0x60] sm:$0xff] %v722_v61  ;;  %755 = vst [vmem:[%s1664_s17 + $0x68] sm:$0xff] %v723_v63 }
 0x1be   : > { %756 = vst [vmem:[%s1664_s17 + $0x70] sm:$0xff] %v724_v40  ;;  %757 = vst [vmem:[%s1664_s17 + $0x78] sm:$0xff] %v725_v3 }
 0x1bf   : > { %758 = vst [vmem:[%s1664_s17 + $0x80] sm:$0xff] %v726_v10  ;;  %759 = vst [vmem:[%s1664_s17 + $0x88] sm:$0xff] %v727_v18 }
 0x1c0   : > { %760 = vst [vmem:[%s1664_s17 + $0x90] sm:$0xff] %v728_v25  ;;  %761 = vst [vmem:[%s1664_s17 + $0x98] sm:$0xff] %v729_v41 }
 0x1c1   : > { %762 = vst [vmem:[%s1664_s17 + $0xa0] sm:$0xff] %v730_v33  ;;  %763 = vst [vmem:[%s1664_s17 + $0xa8] sm:$0xff] %v731_v39 }
 0x1c2   : > { %764 = vst [vmem:[%s1664_s17 + $0xb0] sm:$0xff] %v732_v46  ;;  %765 = vst [vmem:[%s1664_s17 + $0xb8] sm:$0xff] %v733_v7 }
 0x1c3   : > { %766 = vst [vmem:[%s1664_s17 + $0xc0] sm:$0xff] %v734_v50  ;;  %767 = vst [vmem:[%s1664_s17 + $0xc8] sm:$0xff] %v735_v52 }
 0x1c4   : > { %768 = vst [vmem:[%s1664_s17 + $0xd0] sm:$0xff] %v736_v54  ;;  %769 = vst [vmem:[%s1664_s17 + $0xd8] sm:$0xff] %v737_v42 }
 0x1c5   : > { %770 = vst [vmem:[%s1664_s17 + $0xe0] sm:$0xff] %v738_v56  ;;  %771 = vst [vmem:[%s1664_s17 + $0xe8] sm:$0xff] %v739_v58 }
 0x1c6   : > { %772 = vst [vmem:[%s1664_s17 + $0xf0] sm:$0xff] %v740_v60  ;;  %773 = vst [vmem:[%s1664_s17 + $0xf8] sm:$0xff] %v741_v62 }
 0x1c7   : > { %1120 = shalt.err (!%p1117_p3)
}
 0x1c8   : > { %s1121_s23 = scalar_lea.hbm %s1695_s11, 4096  ;;  %s1125_s7 = scalar_lea.hbm %s1767_s3, 8192 }
 0x1c9   : > { %p1122_p12 = scmp.ne.s32.totalorder %s1695_s11, %s1121_s23  ;;  %p1126_p7 = scmp.lt.s32.totalorder %s1695_s11, %s1767_s3 }
 0x1ca   : > { %p1127_p10 = scmp.lt.s32.totalorder %s1125_s7, %s1121_s23 }
 0x1cb   : > { %p1123_p13 = pnand %p1122_p12, %p1783_p4 }
 0x1cc   : > { %p1128_p6 = por %p1127_p10, %p1126_p7 }
 0x1cd   : > { %p1124_p8 = pneg %p1123_p13 }
 0x1cf   : > { %p1129_p2 = pnand %p1128_p6, %p1124_p8 }
 0x1d1   : > { %1132 = shalt.err (!%p1129_p2)
}
 0x1d2   : > { %s1188_s4 = smov 256   ;;  %s1189_s17 = smov 512  }
 0x1d3   : > { %s1190_s20 = smov 16  }
 0x1d4   : > { %957 = dma.vmem_to_hbm [thread:$0]  (%p1783_p4), %s1705_s8, 4096, %s1695_s11, %s775_s18, %s1188_s4, %s1189_s17, %s1190_s20  }
 0x1d5 PF: > { %s803_s24 = sand.u32 1, %s1163_s12   ;;  %p1784_p5 = scmp.ne.s32.totalorder %s1775_s28, 0 }
 0x1d6   : > { %p1785_p9 = scmp.ge.s32.totalorder %s1175_s15, 2  ;;  %s804_s10 = scalar_lea.sflag [#allocation4], %s803_s24 }
 0x1d8   : > { %p971_p1 = pnand %p1785_p9, %p1784_p5 }
 0x1da   : > { %p972_p11 = pneg %p971_p1 }
 0x1dc   : > { %1158 = dma.done.wait (%p972_p11), %s804_s10, 4096  }
 0x1dd   : > { %1160 = vsyncadd (%p972_p11), %s804_s10, 4294963200  ;;  %p17_p0 = scmp.ge.s32.totalorder %s1232_s16, 4   ;;  %s1786_s12 = smov %s1167_s13 }
 0x1de   : > { %s1787_s13 = smov %s1171_s14  ;;  %s1788_s14 = smov %s1243_s19 }
 0x1df   : > { %s1789_s15 = smov %s1232_s16  ;;  %19 = sbr.rel (!%p17_p0) target bundleno = 6 (0x6), region = 94 }
 0x1e4   :  { %809 = vsyncpa [#allocation3], 1 }
 0x1e5   :  { %811 = vsyncpa [#allocation3 + $0x1], 1 }
 0x1e6   :  { %812 = vsyncpa [#allocation6], 1 }
 0x1e7   :  { %814 = vsyncpa [#allocation6 + $0x1], 1 }
 0x1e8   :  { %815 = vsyncpa [#allocation4], 1 }
 0x1e9   :  { %817 = vsyncpa [#allocation4 + $0x1], 1 }

</bundles_post_ra>
